<compile_context>
chip_gen: v5e
topology: v5e:2x2
jax: 0.10.0
libtpu: 0.0.40
codegen_flags: <defaults>
</compile_context>

<pallas_src>
import jax
import jax.numpy as jnp
import numpy as np
from jax.experimental import pallas as pl
from jax.experimental.pallas import tpu as pltpu


# ----------------------------------------------------------------------------
# Kernel
# ----------------------------------------------------------------------------
def critic_ensemble_kernel(
    state_ref,   # (tile_b, S)
    action_ref,  # (tile_b, A)
    w01s_ref,    # (S, E*D1)  state rows of folded (state-norm+encoder)@layer1
    w01a_ref,    # (A, E*D1)  action rows of the same folded weight
    b01_ref,     # (1, E*D1)  folded bias
    w2_ref,      # (1, E*D1)  layer-2 + value_std/E folded into one row
    bias_ref,    # (1,) SMEM  mean(b2)*value_std + value_avg
    out_ref,     # (1, 1, tile_b)  lane-dense: batch rows along lanes
):
    # fused (state-norm + encoder + all-ensemble layer-1) matmuls + ReLU
    h = jnp.dot(state_ref[...], w01s_ref[...], preferred_element_type=jnp.float32)
    h = h + jnp.dot(action_ref[...], w01a_ref[...], preferred_element_type=jnp.float32)
    h = jnp.maximum(h + b01_ref[...], 0.0)                       # (tile_b, E*D1)

    # layer-2 + value re-norm + ensemble mean, contracted "NT" style so the
    # result is lane-dense:  (1, E*D1) x (tile_b, E*D1)^T -> (1, tile_b)
    q = jax.lax.dot_general(
        w2_ref[...], h,
        dimension_numbers=(((1,), (1,)), ((), ())),
        preferred_element_type=jnp.float32,
    )
    out_ref[...] = jnp.reshape(q + bias_ref[0], out_ref.shape)


# ----------------------------------------------------------------------------
# Tiling helpers
# ----------------------------------------------------------------------------
_TILE_CAP = 1024                       # rows; amortizes ~0.35us per grid step
_VMEM_BUDGET = 24 * 1024 * 1024        # stay well under the 32 MiB scoped default


def _round_up(x, m):
    return -(-x // m) * m


def _num_tensorcores():
    """Best-effort: cores a single 'parallel' grid axis can be sharded across
    (v7x / megacore parts -> 2, v5e / v6e -> 1)."""
    try:
        kind = str(getattr(jax.devices()[0], "device_kind", "")).lower()
    except Exception:
        return 1
    if "7" in kind or "v4" in kind or "v5p" in kind:
        return 2
    return 1


def _vmem_bytes_per_step(tile_b, s_dim, a_dim, ed1):
    lane = lambda n: _round_up(max(n, 1), 128)
    sub = lambda n: _round_up(max(n, 1), 8)
    inputs = 2 * tile_b * (lane(s_dim) + lane(a_dim)) * 4        # double-buffered
    weights = 2 * (sub(s_dim) + sub(a_dim) + 8 + 8) * lane(ed1) * 4
    out = 2 * 8 * lane(tile_b) * 4
    return inputs + weights + out


def _choose_tiling(batch, s_dim, a_dim, ed1, num_tc):
    """Return (tile_b, num_tiles); tile_b is a multiple of 8 and the batch is
    padded up to num_tiles * tile_b (never one giant unaligned block)."""
    b8 = _round_up(batch, 8)
    cap = _TILE_CAP
    while cap > 8 and _vmem_bytes_per_step(cap, s_dim, a_dim, ed1) > _VMEM_BUDGET:
        cap //= 2
    if b8 <= cap:
        if num_tc >= 2 and b8 >= 16:
            tile_b = _round_up(-(-b8 // 2), 8)     # 2 even steps for 2 cores
            return tile_b, 2
        return b8, 1                               # single block on 1-TC parts
    tile_b = cap
    num_tiles = -(-b8 // tile_b)
    if num_tc >= 2 and num_tiles % 2:
        num_tiles += 1                             # even step count for 2 cores
    return tile_b, num_tiles


# ----------------------------------------------------------------------------
# Wrapper
# ----------------------------------------------------------------------------
def critic_ensemble_forward(state, action, folded):
    B, S = state.shape
    A = action.shape[1]
    ED1 = folded["w01_s"].shape[1]

    tile_b, num_tiles = _choose_tiling(B, S, A, ED1, _num_tensorcores())
    b_pad = tile_b * num_tiles
    if b_pad != B:
        state = jnp.pad(state, ((0, b_pad - B), (0, 0)))
        action = jnp.pad(action, ((0, b_pad - B), (0, 0)))

    rep = lambda shape: pl.BlockSpec(shape, lambda i: (0, 0))

    grid_spec = pltpu.PrefetchScalarGridSpec(
        num_scalar_prefetch=0,
        grid=(num_tiles,),
        in_specs=[
            pl.BlockSpec((tile_b, S), lambda i: (i, 0)),
            pl.BlockSpec((tile_b, A), lambda i: (i, 0)),
            rep((S, ED1)),
            rep((A, ED1)),
            rep((1, ED1)),
            rep((1, ED1)),
            # scalar bias lives in SMEM (no (8,128) VMEM tile for one float)
            pl.BlockSpec(memory_space=pltpu.MemorySpace.SMEM),
        ],
        # lane-dense output: batch rows live along the 128-lane axis
        out_specs=pl.BlockSpec((1, 1, tile_b), lambda i: (i, 0, 0)),
    )

    out = pl.pallas_call(
        critic_ensemble_kernel,
        out_shape=jax.ShapeDtypeStruct((num_tiles, 1, tile_b), jnp.float32),
        grid_spec=grid_spec,
        compiler_params=pltpu.CompilerParams(
            dimension_semantics=("parallel",),
        ),
    )(
        state, action,
        folded["w01_s"], folded["w01_a"], folded["b01"],
        folded["w2_row"], folded["bias"],
    )
    return out.reshape(b_pad, 1)[:B]


# ----------------------------------------------------------------------------
# Parameters (module-style) + offline algebraic folds
# ----------------------------------------------------------------------------
def init_params(key, state_dim, action_dim, dims, num_ensembles):
    """Deterministic synthetic parameters matching the PyTorch module layout."""
    S, A = state_dim, action_dim
    D0, D1 = dims[0], dims[1]
    E = num_ensembles
    keys = jax.random.split(key, 2 + 3 * E)

    def linear_init(k, fan_in, shape):
        bound = 1.0 / np.sqrt(fan_in)
        return jax.random.uniform(k, shape, jnp.float32, -bound, bound)

    # encoder_sa: Linear(S+A, D0), stored as x @ W (W is (in, out))
    w_enc = linear_init(keys[0], S + A, (S + A, D0))
    b_enc = linear_init(keys[1], S + A, (1, D0))

    orth = jax.nn.initializers.orthogonal(scale=0.5)
    w1_list, b1_list, w2_list = [], [], []
    for e in range(E):
        k1, k2, k3 = keys[2 + 3 * e], keys[3 + 3 * e], keys[4 + 3 * e]
        w1_list.append(linear_init(k1, D0, (D0, D1)))          # (D0, D1)
        b1_list.append(linear_init(k2, D0, (D1,)))             # (D1,)
        w2_list.append(orth(k3, (D1, 1), jnp.float32))         # (D1, 1), std=0.5

    return {
        "state_avg": jnp.zeros((1, S), jnp.float32),
        "state_std": jnp.ones((1, S), jnp.float32),
        "value_avg": jnp.zeros((1, 1), jnp.float32),
        "value_std": jnp.ones((1, 1), jnp.float32),
        "w_enc": w_enc,                 # (S+A, D0)
        "b_enc": b_enc,                 # (1, D0)
        "w1_list": w1_list,
        "b1_list": b1_list,
        "w2_list": w2_list,
        "b2": jnp.full((1, E), 1e-6, jnp.float32),   # final-layer bias = 1e-6
    }


def fold_params(p, state_dim, num_ensembles):
    """Exact algebraic folds:
       state-norm -> encoder, encoder -> layer-1 (no activation in between),
       layer-2 + value re-norm + ensemble mean -> one (1,E*D1) row + scalar."""
    S = state_dim
    E = num_ensembles

    # state normalisation folded into the encoder
    inv_std = 1.0 / p["state_std"]                             # (1, S)
    w_enc_s = p["w_enc"][:S]                                   # (S, D0)
    w_enc_a = p["w_enc"][S:]                                   # (A, D0)
    w_enc_s_f = w_enc_s * inv_std.T                            # scale input rows
    b_enc_f = p["b_enc"] - (p["state_avg"] * inv_std) @ w_enc_s   # (1, D0)

    # all-ensemble layer 1, concatenated along the output axis
    w1_cat = jnp.concatenate(p["w1_list"], axis=1)             # (D0, E*D1)
    b1_cat = jnp.concatenate(p["b1_list"], axis=0)[None, :]    # (1, E*D1)

    # encoder -> layer-1 fold (exact: no nonlinearity between them)
    w01_s = w_enc_s_f @ w1_cat                                 # (S, E*D1)
    w01_a = w_enc_a @ w1_cat                                   # (A, E*D1)
    b01 = b_enc_f @ w1_cat + b1_cat                            # (1, E*D1)

    # layer-2 + value re-norm + mean over ensembles -> one row + one scalar
    v_std = p["value_std"][0, 0]
    v_avg = p["value_avg"][0, 0]
    w2_row = (jnp.concatenate(p["w2_list"], axis=0) * (v_std / E)).T   # (1, E*D1)
    bias = jnp.reshape(v_std * jnp.mean(p["b2"]) + v_avg, (1,)).astype(jnp.float32)

    return {"w01_s": w01_s, "w01_a": w01_a, "b01": b01,
            "w2_row": w2_row, "bias": bias}


# ----------------------------------------------------------------------------
# Pure-JAX reference mirroring the PyTorch forward (no folds)
# ----------------------------------------------------------------------------
def reference_forward(state, action, p, num_ensembles):
    s_norm = (state - p["state_avg"]) / p["state_std"]
    sa_in = jnp.concatenate([s_norm, action], axis=1)
    sa = sa_in @ p["w_enc"] + p["b_enc"]
    vals = []
    for e in range(num_ensembles):
        h = jnp.maximum(sa @ p["w1_list"][e] + p["b1_list"][e], 0.0)
        vals.append(h @ p["w2_list"][e] + p["b2"][:, e:e + 1])
    values = jnp.concatenate(vals, axis=1)                     # (B, E)
    values = values * p["value_std"] + p["value_avg"]
    return jnp.mean(values, axis=1, keepdims=True)             # (B, 1)


if __name__ == "__main__":
    STATE_DIM, ACTION_DIM = 16, 8
    DIMS = [32, 32]
    NUM_ENSEMBLES = 4
    BATCH = 16

    key = jax.random.PRNGKey(0)
    k_p, k_s, k_a, k_n1, k_n2 = jax.random.split(key, 5)

    params = init_params(k_p, STATE_DIM, ACTION_DIM, DIMS, NUM_ENSEMBLES)
    # non-trivial running-norm buffers so the algebraic folds are exercised
    params["state_avg"] = 0.1 * jax.random.normal(k_n1, (1, STATE_DIM), jnp.float32)
    params["state_std"] = 1.0 + 0.2 * jnp.abs(
        jax.random.normal(k_n2, (1, STATE_DIM), jnp.float32))
    params["value_avg"] = jnp.full((1, 1), 0.05, jnp.float32)
    params["value_std"] = jnp.full((1, 1), 0.8, jnp.float32)

    folded = fold_params(params, STATE_DIM, NUM_ENSEMBLES)

    state = jax.random.normal(k_s, (BATCH, STATE_DIM), jnp.float32)
    action = jax.random.normal(k_a, (BATCH, ACTION_DIM), jnp.float32)

    out = critic_ensemble_forward(state, action, folded)
    out = jax.block_until_ready(out)

    ref = reference_forward(state, action, params, NUM_ENSEMBLES)
    assert out.shape == (BATCH, 1)
    np.testing.assert_allclose(np.asarray(out), np.asarray(ref), rtol=1e-5, atol=1e-5)

    print("KERNEL_OK")
</pallas_src>

<mosaic_0001>
module attributes {stable_mosaic.version = 11 : i64} {
  func.func @critic_ensemble_kernel(%arg0: i32, %arg1: memref<16x16xf32, #tpu.memory_space<vmem>>, %arg2: memref<16x8xf32, #tpu.memory_space<vmem>>, %arg3: memref<16x128xf32, #tpu.memory_space<vmem>>, %arg4: memref<8x128xf32, #tpu.memory_space<vmem>>, %arg5: memref<1x128xf32, #tpu.memory_space<vmem>>, %arg6: memref<1x128xf32, #tpu.memory_space<vmem>>, %arg7: memref<1xf32, #tpu.memory_space<smem>>, %arg8: memref<1x1x16xf32, #tpu.memory_space<vmem>>) attributes {dimension_semantics = [#tpu.dimension_semantics<parallel>], iteration_bounds = array<i64: 1>, scalar_prefetch = 0 : i64, scratch_operands = 0 : i64, tpu.core_type = #tpu.core_type<tc>, window_params = [{transform_indices = @transform_0, window_bounds = array<i64: 16, 16>}, {transform_indices = @transform_1, window_bounds = array<i64: 16, 8>}, {pipeline_mode = #tpu.pipeline_mode<synchronous>, transform_indices = @transform_2, window_bounds = array<i64: 16, 128>}, {pipeline_mode = #tpu.pipeline_mode<synchronous>, transform_indices = @transform_3, window_bounds = array<i64: 8, 128>}, {pipeline_mode = #tpu.pipeline_mode<synchronous>, transform_indices = @transform_4, window_bounds = array<i64: 1, 128>}, {pipeline_mode = #tpu.pipeline_mode<synchronous>, transform_indices = @transform_5, window_bounds = array<i64: 1, 128>}, {transform_indices = @transform_6, window_bounds = array<i64: 1>}, {transform_indices = @transform_7, window_bounds = array<i64: 1, 1, 16>}]} {
    %c0 = arith.constant 0 : index
    %c0_0 = arith.constant 0 : index
    %0 = vector.load %arg1[%c0, %c0_0] : memref<16x16xf32, #tpu.memory_space<vmem>>, vector<16x16xf32>
    %c0_1 = arith.constant 0 : index
    %c0_2 = arith.constant 0 : index
    %1 = vector.load %arg3[%c0_1, %c0_2] : memref<16x128xf32, #tpu.memory_space<vmem>>, vector<16x128xf32>
    %cst = arith.constant dense<0.000000e+00> : vector<16x128xf32>
    %2 = tpu.matmul %0, %1, %cst {dimension_numbers = #tpu.dot_dimension_numbers<[1], [0], [0], [1], [0, 0, 1, 1], [], []>} : vector<16x16xf32>, vector<16x128xf32>, vector<16x128xf32> -> vector<16x128xf32>
    %c0_3 = arith.constant 0 : index
    %c0_4 = arith.constant 0 : index
    %3 = vector.load %arg2[%c0_3, %c0_4] : memref<16x8xf32, #tpu.memory_space<vmem>>, vector<16x8xf32>
    %c0_5 = arith.constant 0 : index
    %c0_6 = arith.constant 0 : index
    %4 = vector.load %arg4[%c0_5, %c0_6] : memref<8x128xf32, #tpu.memory_space<vmem>>, vector<8x128xf32>
    %cst_7 = arith.constant dense<0.000000e+00> : vector<16x128xf32>
    %5 = tpu.matmul %3, %4, %cst_7 {dimension_numbers = #tpu.dot_dimension_numbers<[1], [0], [0], [1], [0, 0, 1, 1], [], []>} : vector<16x8xf32>, vector<8x128xf32>, vector<16x128xf32> -> vector<16x128xf32>
    %6 = arith.addf %2, %5 : vector<16x128xf32>
    %c0_8 = arith.constant 0 : index
    %c0_9 = arith.constant 0 : index
    %7 = vector.load %arg5[%c0_8, %c0_9] : memref<1x128xf32, #tpu.memory_space<vmem>>, vector<1x128xf32>
    %8 = vector.broadcast %7 : vector<1x128xf32> to vector<16x128xf32>
    %9 = arith.addf %6, %8 : vector<16x128xf32>
    %cst_10 = arith.constant 0.000000e+00 : f32
    %10 = vector.broadcast %cst_10 : f32 to vector<16x128xf32>
    %11 = arith.maximumf %9, %10 : vector<16x128xf32>
    %c0_11 = arith.constant 0 : index
    %c0_12 = arith.constant 0 : index
    %12 = vector.load %arg6[%c0_11, %c0_12] : memref<1x128xf32, #tpu.memory_space<vmem>>, vector<1x128xf32>
    %cst_13 = arith.constant dense<0.000000e+00> : vector<1x16xf32>
    %13 = tpu.matmul %12, %11, %cst_13 {dimension_numbers = #tpu.dot_dimension_numbers<[1], [1], [0], [0], [0, 0, 1, 0], [], []>} : vector<1x128xf32>, vector<16x128xf32>, vector<1x16xf32> -> vector<1x16xf32>
    %c0_14 = arith.constant 0 : index
    %14 = memref.load %arg7[%c0_14] : memref<1xf32, #tpu.memory_space<smem>>
    %15 = vector.broadcast %14 : f32 to vector<1x16xf32>
    %16 = arith.addf %13, %15 : vector<1x16xf32>
    %17 = vector.shape_cast %16 : vector<1x16xf32> to vector<1x1x16xf32>
    %c0_15 = arith.constant 0 : index
    %c0_16 = arith.constant 0 : index
    %c0_17 = arith.constant 0 : index
    %18 = vector.load %arg8[%c0_15, %c0_16, %c0_17] : memref<1x1x16xf32, #tpu.memory_space<vmem>>, vector<1x1x16xf32>
    tpu.vector_store %arg8[%c0_15, %c0_16, %c0_17], %17 {strides = array<i32>} : memref<1x1x16xf32, #tpu.memory_space<vmem>>, vector<1x1x16xf32>,
    return
  }
  func.func @transform_0(%arg0: i32) -> (i32, i32) {
    %c0_i32 = arith.constant 0 : i32
    %c0_i32_0 = arith.constant 0 : i32
    return %arg0, %c0_i32 : i32, i32
  }
  func.func @transform_1(%arg0: i32) -> (i32, i32) {
    %c0_i32 = arith.constant 0 : i32
    %c0_i32_0 = arith.constant 0 : i32
    return %arg0, %c0_i32 : i32, i32
  }
  func.func @transform_2(%arg0: i32) -> (i32, i32) {
    %c0_i32 = arith.constant 0 : i32
    %c0_i32_0 = arith.constant 0 : i32
    %c0_i32_1 = arith.constant 0 : i32
    return %c0_i32, %c0_i32_0 : i32, i32
  }
  func.func @transform_3(%arg0: i32) -> (i32, i32) {
    %c0_i32 = arith.constant 0 : i32
    %c0_i32_0 = arith.constant 0 : i32
    %c0_i32_1 = arith.constant 0 : i32
    return %c0_i32, %c0_i32_0 : i32, i32
  }
  func.func @transform_4(%arg0: i32) -> (i32, i32) {
    %c0_i32 = arith.constant 0 : i32
    %c0_i32_0 = arith.constant 0 : i32
    %c0_i32_1 = arith.constant 0 : i32
    return %c0_i32, %c0_i32_0 : i32, i32
  }
  func.func @transform_5(%arg0: i32) -> (i32, i32) {
    %c0_i32 = arith.constant 0 : i32
    %c0_i32_0 = arith.constant 0 : i32
    %c0_i32_1 = arith.constant 0 : i32
    return %c0_i32, %c0_i32_0 : i32, i32
  }
  func.func @transform_6(%arg0: i32) -> i32 {
    %c0_i32 = arith.constant 0 : i32
    %c0_i32_0 = arith.constant 0 : i32
    return %c0_i32 : i32
  }
  func.func @transform_7(%arg0: i32) -> (i32, i32, i32) {
    %c0_i32 = arith.constant 0 : i32
    %c0_i32_0 = arith.constant 0 : i32
    %c0_i32_1 = arith.constant 0 : i32
    return %arg0, %c0_i32, %c0_i32_0 : i32, i32, i32
  }
}

</mosaic_0001>

<bundles_post_ra>
// kernel: tpu_custom_call.1
= control target key start
LH: loop header
LB: loop body
LE: loop exit
PB: predicated region body
PF: predicated region fallthrough
CT: control target
= control target key end

     0   :  { %13 = vsyncpa [#allocation4], 0  ;;  %s300_s0 = inlined_call_operand.vmem [shape: f32[16,16], index: 0, kind: input, shape index: {}]   ;;  %s301_s1 = inlined_call_operand.vmem [shape: f32[16,8], index: 1, kind: input, shape index: {}]   ;;  %s302_s2 = inlined_call_operand.hbm [shape: f32[16,128], index: 2, kind: input, shape index: {}]   ;;  %s303_s3 = inlined_call_operand.vmem [shape: f32[8,128], index: 3, kind: input, shape index: {}]   ;;  %s304_s4 = inlined_call_operand.vmem [shape: f32[1,128], index: 4, kind: input, shape index: {}]   ;;  %s305_s5 = inlined_call_operand.vmem [shape: f32[1,128], index: 5, kind: input, shape index: {}]   ;;  %s306_s6 = inlined_call_operand.<no memory space> [shape: f32[1], index: 6, kind: input, shape index: {}]   ;;  %s307_s7 = inlined_call_operand.hbm [shape: f32[1,1,16], index: 7, kind: output, shape index: {}]  }
   0x1   :  { %14 = vsyncpa [#allocation5], 0  ;;  %s23_s26 = sshll.u32 %s302_s2, 4  ;;  %s224_s27 = smov [#allocation3]   ;;  %s24_s26 = int_to_ptr.hbm [resolvable:$true] %s23_s26 }
   0x2   :  { %s25_s28 = sshll.u32 %s224_s27, 4  ;;  %s225_s29 = smov 128   ;;  %s26_s28 = int_to_ptr.vmem [resolvable:$true] %s25_s28 }
   0x3   :  { %s226_s30 = smov 8  }
   0x4   :  { %31 = dma.hbm_to_vmem [thread:$0]  %s24_s26, 256, %s26_s28, [#allocation4], %s225_s29, %s225_s29, %s226_s30  }
   0x5   :  { %220 = dma.done.wait [#allocation4], 256  }
   0x6   :  { %221 = vsyncadd [#allocation4], 4294967040  ;;  %vm51_vm0 = vcmask 64512   ;;  %v50_v0 = vld [vmem:[%s303_s3] sm:$0xff]  ;;  %v47_v1 = vld [vmem:[#allocation3 + $0x8] sm:$0xff]  ;;  %vm81_vm1 = vcmask 130048   ;;  %v121_v19 = vstv %s306_s6 }
   0x7   :  { %v48_v2 = vld [vmem:[%s301_s1] sm:$0xff]  ;;  %73 = vmatpush.msra.mxu0 %v50_v0  ;;  %102 = vmatpush.msra.mxu1 %v47_v1  ;;  %v45_v5 = vld [vmem:[%s300_s0 + $0x8] sm:$0xff]  ;;  %s227_s20 = smov [#allocation6]   ;;  %vm142_vm2 = vcmask 122880  }
   0x8   :  { %v46_v3 = vld [vmem:[#allocation3] sm:$0xff]  ;;  %165 = vmatpush.msra.mxu3 %v47_v1  ;;  %161 = vmatmul.msk.f32.vlgmr.msra.gmra.mxu0 %vm51_vm0, %v48_v2  ;;  %v49_v6 = vld [vmem:[%s301_s1 + $0x8] sm:$0xff]  ;;  %s149_s21 = sshll.u32 %s227_s20, 4  ;;  %s150_s21 = int_to_ptr.vmem [resolvable:$true] %s149_s21 }
   0x9   :  { %v44_v4 = vld [vmem:[%s300_s0] sm:$0xff]  ;;  %103 = vmatpush.msra.mxu1 %v46_v3 }
   0xa   :  { %166 = vmatpush.msra.mxu3 %v46_v3  ;;  %163 = vmatmul.msk.f32.vlgmr.msra.gmra.mxu1 %vm81_vm1, %v44_v4  ;;  %v171_v13 = vld [vmem:[%s304_s4] ss:$0 sm:$0xff]  ;;  %s151_s4 = sshll.u32 %s307_s7, 4  ;;  %s152_s4 = int_to_ptr.hbm [resolvable:$true] %s151_s4 }
   0xb   :  { %164 = vmatmul.msk.f32.vlgmr.msra.gmra.mxu3 %vm81_vm1, %v45_v5  ;;  %v119_v18 = vld [vmem:[%s305_s5] sm:$0x1] }
  0x10   :  { %162 = vmatmul.msk.f32.gmra.mxu0 %vm51_vm0, %v49_v6 }
  0x85   :  { %v75_v7 = vpop.f32.mrf.mxu0 }
  0x87   :  { %v105_v8 = vpop.f32.mrf.mxu1 }
  0x88   :  { %v106_v11 = vadd.f32 %v105_v8, %v75_v7 }
  0x8a   :  { %v115_v16 = vadd.f32 %v171_v13, %v106_v11 }
  0x8c   :  { %v117_v17 = vmax.f32 %v115_v16, 0.0 }
  0x8d   :  { %v78_v9 = vpop.f32.mrf.mxu0 }
  0x8e   :  { %v108_v10 = vpop.f32.mrf.mxu3 }
  0x8f   :  { %v109_v12 = vadd.f32 %v108_v10, %v78_v9 }
  0x91   :  { %v116_v14 = vadd.f32 %v171_v13, %v109_v12 }
  0x93   :  { %v118_v15 = vmax.f32 %v116_v14, 0.0 }
  0x95   :  { %136 = vmatpush.xpose.msra.mxu2 %v118_v15 }
  0x99   :  { %137 = vmatpush.xpose.msra.mxu2 %v117_v17 }
  0x9c   :  { %138 = vmatmul.f32.vlgmr.msra.gmra.mxu2 %v119_v18 }
 0x11f   :  { %v139_v20 = vpop.f32.mrf.mxu2 }
 0x120   :  { %v140_v21 = vadd.f32 %v139_v20, %v121_v19 }
 0x122   :  { %143 = vst.msk [vmem:[#allocation6] sm:$0x1] %vm142_vm2, %v140_v21 }
 0x123   :  { %154 = dma.vmem_to_hbm [thread:$0]  %s150_s21, 16, %s152_s4, [#allocation5]  }
 0x124   :  { %222 = dma.done.wait [#allocation5], 16  }
 0x125   :  { %223 = vsyncadd [#allocation5], 4294967280 }
 0x126   :  { %159 = vsyncpa [#allocation4], 1 }
 0x127   :  { %160 = vsyncpa [#allocation5], 1 }

</bundles_post_ra>
